<compile_context>
chip_gen: v7x
topology: tpu7x:2x2x1
jax: 0.10.0
libtpu: 0.0.40
codegen_flags: <defaults>
</compile_context>

<pallas_src>
import jax
import jax.numpy as jnp
from jax.experimental import pallas as pl
from jax.experimental.pallas import tpu as pltpu

EPS = 1e-5


# ----------------------------------------------------------------------------
# Literal spec module: Identity.forward(x) = x, as a lane-dense Pallas copy.
# ----------------------------------------------------------------------------
def identity_kernel(x_ref, o_ref):
    o_ref[...] = x_ref[...]


def identity_forward(x):
    n = x.size
    lanes = 128 if n % 128 == 0 else n          # lane-dense flat view
    flat = x.reshape(n // lanes, lanes)
    out = pl.pallas_call(
        identity_kernel,
        out_shape=jax.ShapeDtypeStruct(flat.shape, flat.dtype),
    )(flat)
    return out.reshape(x.shape)


# ----------------------------------------------------------------------------
# Fused ConvBlock kernel:
#   conv3x3 (im2col matmul) -> BatchNorm2d (batch stats) -> ReLU
#   -> conv1x1 (matmul)     -> LayerNorm (per sample)    -> ReLU
# Layout: channels on sublanes, Ho*Wo on lanes (lane-dense).
#   pT_ref : (N, K, HW)     w1T_ref: (C1, K)     g/beta : (C1, 1)
#   w2T_ref: (C2, C1)       b2_ref : (C2, 1)     lnw/lnb: (C2, HW)
#   o_ref  : (N, C2, HW)    y1_sc  : VMEM scratch (N, C1, HW)
# ----------------------------------------------------------------------------
def conv_block_fused_kernel(pT_ref, w1T_ref, g_ref, beta_ref, w2T_ref, b2_ref,
                            lnw_ref, lnb_ref, o_ref, y1_sc):
    n_batch = pT_ref.shape[0]

    # ---- layer 1: 3x3 conv as (C1, K) @ (K, HW) per sample (lane axis = HW).
    # conv bias b1 is intentionally omitted: it is cancelled exactly by the
    # BatchNorm mean subtraction and does not affect the variance.
    for n in range(n_batch):
        y1_sc[n] = jnp.dot(w1T_ref[...], pT_ref[n],
                           preferred_element_type=jnp.float32)
    y1 = y1_sc[...]                                            # (N, C1, HW)

    # ---- BatchNorm2d, training-mode biased stats per channel over N*HW.
    # (decomposed single-axis reduces: lane reduce, then leading-dim reduce)
    mean = jnp.mean(jnp.mean(y1, axis=2, keepdims=True), axis=0, keepdims=True)
    diff = y1 - mean
    var = jnp.mean(jnp.mean(diff * diff, axis=2, keepdims=True),
                   axis=0, keepdims=True)
    y1 = diff * jax.lax.rsqrt(var + EPS)
    y1 = jnp.maximum(y1 * g_ref[...] + beta_ref[...], 0.0)     # affine + ReLU

    # ---- layer 2: 1x1 conv + per-sample LayerNorm over (C2, HW) + ReLU.
    for n in range(n_batch):
        y2 = jnp.dot(w2T_ref[...], y1[n],
                     preferred_element_type=jnp.float32) + b2_ref[...]
        m2 = jnp.mean(y2)                                      # over C2*HW
        v2 = jnp.mean((y2 - m2) ** 2)                          # biased variance
        y2 = (y2 - m2) * jax.lax.rsqrt(v2 + EPS)
        y2 = y2 * lnw_ref[...] + lnb_ref[...]
        o_ref[n] = jnp.maximum(y2, 0.0)


def conv_block_forward(x_nchw, params):
    """Forward pass of the fixed ConvBlock config. x_nchw: (N, 4, 16, 16) f32."""
    w1, b1, bn_g, bn_b, w2, b2, ln_w, ln_b = params
    del b1  # cancelled by BatchNorm mean subtraction (kept in params for parity)

    N, Cin, H, W = x_nchw.shape
    kh = kw = 3
    Ho, Wo = H - kh + 1, W - kw + 1          # 14, 14
    HW = Ho * Wo                             # 196
    C1 = w1.shape[0]                         # 8
    C2 = w2.shape[0]                         # 16
    K = kh * kw * Cin                        # 36

    # --- glue: im2col directly in NCHW; K on sublanes, Ho*Wo on lanes --------
    cols = [x_nchw[:, :, i:i + Ho, j:j + Wo] for i in range(kh) for j in range(kw)]
    pT = jnp.concatenate(cols, axis=1).reshape(N, K, HW)        # (N, K, HW)

    # (C1, Cin, kh, kw) -> (C1, kh, kw, Cin) -> (C1, K): matches pT's K order.
    w1T = jnp.transpose(w1, (0, 2, 3, 1)).reshape(C1, K)
    w2T = w2.reshape(C2, C1)                                    # 1x1 conv weight
    lnw = ln_w.reshape(C2, HW)
    lnb = ln_b.reshape(C2, HW)

    out = pl.pallas_call(
        conv_block_fused_kernel,
        out_shape=jax.ShapeDtypeStruct((N, C2, HW), jnp.float32),
        grid=(1,),
        in_specs=[
            pl.BlockSpec((N, K, HW), lambda i: (0, 0, 0)),
            pl.BlockSpec((C1, K), lambda i: (0, 0)),
            pl.BlockSpec((C1, 1), lambda i: (0, 0)),
            pl.BlockSpec((C1, 1), lambda i: (0, 0)),
            pl.BlockSpec((C2, C1), lambda i: (0, 0)),
            pl.BlockSpec((C2, 1), lambda i: (0, 0)),
            pl.BlockSpec((C2, HW), lambda i: (0, 0)),
            pl.BlockSpec((C2, HW), lambda i: (0, 0)),
        ],
        out_specs=pl.BlockSpec((N, C2, HW), lambda i: (0, 0, 0)),
        scratch_shapes=[pltpu.VMEM((N, C1, HW), jnp.float32)],
        compiler_params=pltpu.CompilerParams(dimension_semantics=("arbitrary",)),
    )(pT, w1T, bn_g.reshape(C1, 1), bn_b.reshape(C1, 1),
      w2T, b2.reshape(C2, 1), lnw, lnb)

    # Lane-dense kernel output (N, C2, Ho*Wo) -> NCHW is a free reshape.
    return out.reshape(N, C2, Ho, Wo)


def reference_forward(x_nchw, params):
    """Pure-JAX reference with identical semantics (uses b1 explicitly)."""
    w1, b1, bn_g, bn_b, w2, b2, ln_w, ln_b = params
    dn = ("NCHW", "OIHW", "NCHW")
    y = jax.lax.conv_general_dilated(x_nchw, w1, (1, 1), "VALID",
                                     dimension_numbers=dn)
    y = y + b1.reshape(1, -1, 1, 1)
    mean = jnp.mean(y, axis=(0, 2, 3), keepdims=True)
    var = jnp.mean((y - mean) ** 2, axis=(0, 2, 3), keepdims=True)
    y = (y - mean) * jax.lax.rsqrt(var + EPS)
    y = y * bn_g.reshape(1, -1, 1, 1) + bn_b.reshape(1, -1, 1, 1)
    y = jnp.maximum(y, 0.0)
    y = jax.lax.conv_general_dilated(y, w2, (1, 1), "VALID",
                                     dimension_numbers=dn)
    y = y + b2.reshape(1, -1, 1, 1)
    mean = jnp.mean(y, axis=(1, 2, 3), keepdims=True)
    var = jnp.mean((y - mean) ** 2, axis=(1, 2, 3), keepdims=True)
    y = (y - mean) * jax.lax.rsqrt(var + EPS)
    y = y * ln_w[None] + ln_b[None]
    return jnp.maximum(y, 0.0)


if __name__ == "__main__":
    key = jax.random.PRNGKey(0)
    ks = jax.random.split(key, 9)

    N, Cin, H, W = 2, 4, 16, 16
    C1, C2 = 8, 16
    Ho = Wo = H - 2

    x = jax.random.normal(ks[0], (N, Cin, H, W), jnp.float32)

    # Deterministic params (shapes follow nn.Conv2d / BatchNorm2d / LayerNorm).
    # Non-trivial affine params so the layout of the affine paths is validated.
    w1 = jax.random.normal(ks[1], (C1, Cin, 3, 3), jnp.float32) * 0.1
    b1 = jax.random.normal(ks[2], (C1,), jnp.float32) * 0.1
    bn_g = 1.0 + 0.1 * jax.random.normal(ks[5], (C1,), jnp.float32)
    bn_b = 0.1 * jax.random.normal(ks[6], (C1,), jnp.float32)
    w2 = jax.random.normal(ks[3], (C2, C1, 1, 1), jnp.float32) * 0.1
    b2 = jax.random.normal(ks[4], (C2,), jnp.float32) * 0.1
    ln_w = 1.0 + 0.1 * jax.random.normal(ks[7], (C2, Ho, Wo), jnp.float32)
    ln_b = 0.1 * jax.random.normal(ks[8], (C2, Ho, Wo), jnp.float32)

    params = (w1, b1, bn_g, bn_b, w2, b2, ln_w, ln_b)

    # Literal spec module (Identity): Pallas copy kernel.
    ident = jax.block_until_ready(jax.jit(identity_forward)(x))
    assert jnp.array_equal(ident, x)

    # Fused ConvBlock kernel vs pure-JAX reference.
    out = jax.block_until_ready(jax.jit(conv_block_forward)(x, params))
    ref = reference_forward(x, params)
    assert out.shape == (N, C2, Ho, Wo), out.shape
    assert jnp.allclose(out, ref, atol=1e-4, rtol=1e-4), \
        float(jnp.max(jnp.abs(out - ref)))

    print("KERNEL_OK")
</pallas_src>

<mosaic_0001>
module attributes {stable_mosaic.version = 11 : i64} {
  func.func @identity_kernel(%arg0: memref<16x128xf32, #tpu.memory_space<vmem>>, %arg1: memref<16x128xf32, #tpu.memory_space<vmem>>) attributes {dimension_semantics = [], scalar_prefetch = 0 : i64, scratch_operands = 0 : i64, tpu.core_type = #tpu.core_type<tc>} {
    %c0 = arith.constant 0 : index
    %c0_0 = arith.constant 0 : index
    %0 = vector.load %arg0[%c0, %c0_0] : memref<16x128xf32, #tpu.memory_space<vmem>>, vector<16x128xf32>
    %c0_1 = arith.constant 0 : index
    %c0_2 = arith.constant 0 : index
    %1 = vector.load %arg1[%c0_1, %c0_2] : memref<16x128xf32, #tpu.memory_space<vmem>>, vector<16x128xf32>
    tpu.vector_store %arg1[%c0_1, %c0_2], %0 {strides = array<i32>} : memref<16x128xf32, #tpu.memory_space<vmem>>, vector<16x128xf32>,
    return
  }
}

</mosaic_0001>

<bundles_post_ra>
// kernel: identity_forward.1
= control target key start
LH: loop header
LB: loop body
LE: loop exit
PB: predicated region body
PF: predicated region fallthrough
CT: control target
= control target key end

     0   :  { %s38_s0 = inlined_call_operand.vmem [shape: f32[16,128], index: 0, kind: input, shape index: {}]   ;;  %s39_s1 = inlined_call_operand.vmem [shape: f32[16,128], index: 1, kind: output, shape index: {}]  }
   0x1   :  { %v8_v0 = vld [vmem:[%s38_s0] sm:$0xff]  ;;  %v9_v1 = vld [vmem:[%s38_s0 + $0x8] sm:$0xff] }
   0x2   :  { %10 = vst [vmem:[%s39_s1] sm:$0xff] %v8_v0  ;;  %11 = vst [vmem:[%s39_s1 + $0x8] sm:$0xff] %v9_v1 }

</bundles_post_ra>
